<compile_context>
chip_gen: v5e
topology: v5e:2x2
jax: 0.10.0
libtpu: 0.0.40
codegen_flags: <defaults>
</compile_context>

<pallas_src>
import functools

import jax
import jax.numpy as jnp
from jax.experimental import pallas as pl
from jax.experimental.pallas import tpu as pltpu


# ----------------------------- Pallas kernel -------------------------------

def _fused_gcn_encoder_kernel(adj_ref, x_ref,
                              w0_ref, b0_ref,
                              w1_ref, b1_ref,
                              ws_ref, bs_ref,
                              wml_ref, bml_ref,
                              out_ref):
    """Whole GCNEncoder forward in one kernel.

    adj_ref : [N, N]  bf16 normalized adjacency (with self-loops)
    x_ref   : [N, C]  f32 node features
    w*_ref  : f32 layer weights (wml = concat(w_mu, w_logvar) -> [C, 2C])
    b*_ref  : f32 biases [1, C] / [1, 2C]
    out_ref : [N, 2C] f32  (mu || logvar)
    """
    adj = adj_ref[...]  # bf16, loaded once, reused by all 4 aggregation matmuls

    def gcn_layer(h, w, b, relu=False):
        # Feature transform in f32 (small C), aggregation on the MXU in bf16
        # with f32 accumulation; bias + ReLU in f32.
        xw = jnp.dot(h, w, preferred_element_type=jnp.float32)
        agg = jnp.dot(adj, xw.astype(jnp.bfloat16),
                      preferred_element_type=jnp.float32)
        out = agg + b
        if relu:
            out = jnp.maximum(out, 0.0)
        return out

    # TODO(synk): dropout(p=0.5) inside GCNConv is training-only; identity in eval.
    h = x_ref[...]
    h = gcn_layer(h, w0_ref[...], b0_ref[...])               # encoder[0] (+flatten(1) = id)
    h = gcn_layer(h, w1_ref[...], b1_ref[...])                # encoder[1]
    x = gcn_layer(h, ws_ref[...], bs_ref[...], relu=True)     # relu(gcn_shared(...))
    out = gcn_layer(x, wml_ref[...], bml_ref[...])            # [gcn_mu | gcn_logvar]
    out_ref[...] = out.astype(out_ref.dtype)


def gcn_encoder_fused(adj, x, params):
    """Run the whole encoder as one Pallas call. Returns (mu, logvar)."""
    (w0, b0), (w1, b1), (ws, bs), (wm, bm), (wl, bl) = params

    # Fuse the two output heads into a single lane-denser matmul/store.
    wml = jnp.concatenate([wm, wl], axis=1)        # [C, 2*C_out]
    bml = jnp.concatenate([bm, bl], axis=1)        # [1, 2*C_out]

    n, c = x.shape
    c_out = wm.shape[1]
    adj_bf16 = adj.astype(jnp.bfloat16)            # halves adj HBM bytes

    # Advisory cost estimate: 4 layers of (X@W + A@XW).
    flops = (3 * (2 * n * c * c + 2 * n * n * c)           # enc0, enc1, shared
             + (2 * n * c * (2 * c_out) + 2 * n * n * (2 * c_out)))  # mu|logvar head
    bytes_accessed = (2 * n * n                              # adj (bf16)
                      + 4 * n * c                            # x
                      + 4 * (3 * c * c + c * 2 * c_out)      # weights
                      + 4 * (3 * c + 2 * c_out)              # biases
                      + 4 * n * 2 * c_out)                   # output
    cost = pl.CostEstimate(flops=flops, transcendentals=0,
                           bytes_accessed=bytes_accessed)

    # Whole-array VMEM residency: everything fits comfortably at these sizes.
    # (For very large N, raise vmem_limit_bytes via pltpu.CompilerParams or
    #  switch to the tiled per-layer fallback noted above.)
    vmem = pl.BlockSpec(memory_space=pltpu.MemorySpace.VMEM)

    out = pl.pallas_call(
        _fused_gcn_encoder_kernel,
        out_shape=jax.ShapeDtypeStruct((n, 2 * c_out), jnp.float32),
        in_specs=[vmem] * 10,
        out_specs=vmem,
        cost_estimate=cost,
    )(adj_bf16, x, w0, b0, w1, b1, ws, bs, wml, bml)

    mu = out[:, :c_out]
    logvar = out[:, c_out:]
    return mu, logvar


# ------------------------------ JAX glue ------------------------------------

def normalized_adjacency(edge_index, num_nodes):
    """Dense GCN adjacency: A_hat = D^-1/2 (A + I) D^-1/2, A[dst, src] += 1.

    Uses scatter-ADD so duplicate edges count their multiplicity, matching
    PyG's gcn_norm (scatter_add) degree normalization.
    """
    src = edge_index[0]
    dst = edge_index[1]
    a = jnp.zeros((num_nodes, num_nodes), jnp.float32)
    a = a.at[dst, src].add(1.0)
    a = a + jnp.eye(num_nodes, dtype=jnp.float32)          # self loops
    deg = jnp.sum(a, axis=1)
    d_inv_sqrt = jnp.where(deg > 0, 1.0 / jnp.sqrt(deg), 0.0)
    return d_inv_sqrt[:, None] * a * d_inv_sqrt[None, :]


def init_params(key, in_channels, out_channels):
    """Deterministic glorot-uniform weights + zero bias for all 5 GCNConv layers."""
    # encoder[0], encoder[1], gcn_shared, gcn_mu, gcn_logvar
    dims = [
        (in_channels, out_channels),   # encoder[0]
        (in_channels, out_channels),   # encoder[1]
        (in_channels, in_channels),    # gcn_shared
        (in_channels, out_channels),   # gcn_mu
        (in_channels, out_channels),   # gcn_logvar
    ]
    params = []
    keys = jax.random.split(key, len(dims))
    for k, (ci, co) in zip(keys, dims):
        limit = jnp.sqrt(6.0 / (ci + co))
        w = jax.random.uniform(k, (ci, co), jnp.float32, -limit, limit)
        b = jnp.zeros((1, co), jnp.float32)
        params.append((w, b))
    return params


def gcn_encoder_forward(params, edge_emb_eq1, edge_index):
    """Mirrors GCNEncoder.forward (eval mode: dropout is identity)."""
    num_nodes = edge_emb_eq1.shape[0]
    adj = normalized_adjacency(edge_index, num_nodes)
    return gcn_encoder_fused(adj, edge_emb_eq1, params)


# ------------------------------- main ---------------------------------------

if __name__ == "__main__":
    N = 16            # number of graph nodes
    C = 32            # in_channels == out_channels (required for shape consistency)
    E = 48            # number of edges

    key = jax.random.PRNGKey(0)
    k_feat, k_edges, k_params = jax.random.split(key, 3)

    edge_emb_eq1 = jax.random.normal(k_feat, (N, C), jnp.float32)
    edge_index = jax.random.randint(k_edges, (2, E), 0, N, jnp.int32)

    params = init_params(k_params, C, C)

    mu, logvar = jax.jit(gcn_encoder_forward)(params, edge_emb_eq1, edge_index)
    jax.block_until_ready((mu, logvar))

    assert mu.shape == (N, C) and logvar.shape == (N, C)
    assert mu.dtype == jnp.float32 and logvar.dtype == jnp.float32
    assert bool(jnp.all(jnp.isfinite(mu))) and bool(jnp.all(jnp.isfinite(logvar)))

    print("KERNEL_OK")
</pallas_src>

<mosaic_0001>
module attributes {stable_mosaic.version = 11 : i64} {
  func.func @_fused_gcn_encoder_kernel(%arg0: memref<16x16xbf16, #tpu.memory_space<vmem>>, %arg1: memref<16x32xf32, #tpu.memory_space<vmem>>, %arg2: memref<32x32xf32, #tpu.memory_space<vmem>>, %arg3: memref<1x32xf32, #tpu.memory_space<vmem>>, %arg4: memref<32x32xf32, #tpu.memory_space<vmem>>, %arg5: memref<1x32xf32, #tpu.memory_space<vmem>>, %arg6: memref<32x32xf32, #tpu.memory_space<vmem>>, %arg7: memref<1x32xf32, #tpu.memory_space<vmem>>, %arg8: memref<32x64xf32, #tpu.memory_space<vmem>>, %arg9: memref<1x64xf32, #tpu.memory_space<vmem>>, %arg10: memref<16x64xf32, #tpu.memory_space<vmem>>) attributes {dimension_semantics = [], scalar_prefetch = 0 : i64, scratch_operands = 0 : i64, tpu.core_type = #tpu.core_type<tc>} {
    %c0 = arith.constant 0 : index
    %c0_0 = arith.constant 0 : index
    %0 = vector.load %arg0[%c0, %c0_0] : memref<16x16xbf16, #tpu.memory_space<vmem>>, vector<16x16xbf16>
    %c0_1 = arith.constant 0 : index
    %c0_2 = arith.constant 0 : index
    %1 = vector.load %arg1[%c0_1, %c0_2] : memref<16x32xf32, #tpu.memory_space<vmem>>, vector<16x32xf32>
    %c0_3 = arith.constant 0 : index
    %c0_4 = arith.constant 0 : index
    %2 = vector.load %arg2[%c0_3, %c0_4] : memref<32x32xf32, #tpu.memory_space<vmem>>, vector<32x32xf32>
    %c0_5 = arith.constant 0 : index
    %c0_6 = arith.constant 0 : index
    %3 = vector.load %arg3[%c0_5, %c0_6] : memref<1x32xf32, #tpu.memory_space<vmem>>, vector<1x32xf32>
    %cst = arith.constant dense<0.000000e+00> : vector<16x32xf32>
    %4 = tpu.matmul %1, %2, %cst {dimension_numbers = #tpu.dot_dimension_numbers<[1], [0], [0], [1], [0, 0, 1, 1], [], []>} : vector<16x32xf32>, vector<32x32xf32>, vector<16x32xf32> -> vector<16x32xf32>
    %5 = arith.truncf %4 : vector<16x32xf32> to vector<16x32xbf16>
    %cst_7 = arith.constant dense<0.000000e+00> : vector<16x32xf32>
    %6 = tpu.matmul %0, %5, %cst_7 {dimension_numbers = #tpu.dot_dimension_numbers<[1], [0], [0], [1], [0, 0, 1, 1], [], []>} : vector<16x16xbf16>, vector<16x32xbf16>, vector<16x32xf32> -> vector<16x32xf32>
    %7 = vector.broadcast %3 : vector<1x32xf32> to vector<16x32xf32>
    %8 = arith.addf %6, %7 : vector<16x32xf32>
    %c0_8 = arith.constant 0 : index
    %c0_9 = arith.constant 0 : index
    %9 = vector.load %arg4[%c0_8, %c0_9] : memref<32x32xf32, #tpu.memory_space<vmem>>, vector<32x32xf32>
    %c0_10 = arith.constant 0 : index
    %c0_11 = arith.constant 0 : index
    %10 = vector.load %arg5[%c0_10, %c0_11] : memref<1x32xf32, #tpu.memory_space<vmem>>, vector<1x32xf32>
    %cst_12 = arith.constant dense<0.000000e+00> : vector<16x32xf32>
    %11 = tpu.matmul %8, %9, %cst_12 {dimension_numbers = #tpu.dot_dimension_numbers<[1], [0], [0], [1], [0, 0, 1, 1], [], []>} : vector<16x32xf32>, vector<32x32xf32>, vector<16x32xf32> -> vector<16x32xf32>
    %12 = arith.truncf %11 : vector<16x32xf32> to vector<16x32xbf16>
    %cst_13 = arith.constant dense<0.000000e+00> : vector<16x32xf32>
    %13 = tpu.matmul %0, %12, %cst_13 {dimension_numbers = #tpu.dot_dimension_numbers<[1], [0], [0], [1], [0, 0, 1, 1], [], []>} : vector<16x16xbf16>, vector<16x32xbf16>, vector<16x32xf32> -> vector<16x32xf32>
    %14 = vector.broadcast %10 : vector<1x32xf32> to vector<16x32xf32>
    %15 = arith.addf %13, %14 : vector<16x32xf32>
    %c0_14 = arith.constant 0 : index
    %c0_15 = arith.constant 0 : index
    %16 = vector.load %arg6[%c0_14, %c0_15] : memref<32x32xf32, #tpu.memory_space<vmem>>, vector<32x32xf32>
    %c0_16 = arith.constant 0 : index
    %c0_17 = arith.constant 0 : index
    %17 = vector.load %arg7[%c0_16, %c0_17] : memref<1x32xf32, #tpu.memory_space<vmem>>, vector<1x32xf32>
    %cst_18 = arith.constant dense<0.000000e+00> : vector<16x32xf32>
    %18 = tpu.matmul %15, %16, %cst_18 {dimension_numbers = #tpu.dot_dimension_numbers<[1], [0], [0], [1], [0, 0, 1, 1], [], []>} : vector<16x32xf32>, vector<32x32xf32>, vector<16x32xf32> -> vector<16x32xf32>
    %19 = arith.truncf %18 : vector<16x32xf32> to vector<16x32xbf16>
    %cst_19 = arith.constant dense<0.000000e+00> : vector<16x32xf32>
    %20 = tpu.matmul %0, %19, %cst_19 {dimension_numbers = #tpu.dot_dimension_numbers<[1], [0], [0], [1], [0, 0, 1, 1], [], []>} : vector<16x16xbf16>, vector<16x32xbf16>, vector<16x32xf32> -> vector<16x32xf32>
    %21 = vector.broadcast %17 : vector<1x32xf32> to vector<16x32xf32>
    %22 = arith.addf %20, %21 : vector<16x32xf32>
    %cst_20 = arith.constant 0.000000e+00 : f32
    %23 = vector.broadcast %cst_20 : f32 to vector<16x32xf32>
    %24 = arith.maximumf %22, %23 : vector<16x32xf32>
    %c0_21 = arith.constant 0 : index
    %c0_22 = arith.constant 0 : index
    %25 = vector.load %arg8[%c0_21, %c0_22] : memref<32x64xf32, #tpu.memory_space<vmem>>, vector<32x64xf32>
    %c0_23 = arith.constant 0 : index
    %c0_24 = arith.constant 0 : index
    %26 = vector.load %arg9[%c0_23, %c0_24] : memref<1x64xf32, #tpu.memory_space<vmem>>, vector<1x64xf32>
    %cst_25 = arith.constant dense<0.000000e+00> : vector<16x64xf32>
    %27 = tpu.matmul %24, %25, %cst_25 {dimension_numbers = #tpu.dot_dimension_numbers<[1], [0], [0], [1], [0, 0, 1, 1], [], []>} : vector<16x32xf32>, vector<32x64xf32>, vector<16x64xf32> -> vector<16x64xf32>
    %28 = arith.truncf %27 : vector<16x64xf32> to vector<16x64xbf16>
    %cst_26 = arith.constant dense<0.000000e+00> : vector<16x64xf32>
    %29 = tpu.matmul %0, %28, %cst_26 {dimension_numbers = #tpu.dot_dimension_numbers<[1], [0], [0], [1], [0, 0, 1, 1], [], []>} : vector<16x16xbf16>, vector<16x64xbf16>, vector<16x64xf32> -> vector<16x64xf32>
    %30 = vector.broadcast %26 : vector<1x64xf32> to vector<16x64xf32>
    %31 = arith.addf %29, %30 : vector<16x64xf32>
    %c0_27 = arith.constant 0 : index
    %c0_28 = arith.constant 0 : index
    %32 = vector.load %arg10[%c0_27, %c0_28] : memref<16x64xf32, #tpu.memory_space<vmem>>, vector<16x64xf32>
    tpu.vector_store %arg10[%c0_27, %c0_28], %31 {strides = array<i32>} : memref<16x64xf32, #tpu.memory_space<vmem>>, vector<16x64xf32>,
    return
  }
}

</mosaic_0001>

<bundles_post_ra>
// kernel: gcn_encoder_forward.1
= control target key start
LH: loop header
LB: loop body
LE: loop exit
PB: predicated region body
PF: predicated region fallthrough
CT: control target
= control target key end

     0   :  { %vm45_vm0 = vcmask 261120   ;;  %vm84_vm1 = vcmask 130048   ;;  %vm260_vm2 = vcmask 523264   ;;  %s436_s2 = inlined_call_operand.vmem [shape: f32[32,32], index: 2, kind: input, shape index: {}]   ;;  %s437_s1 = inlined_call_operand.vmem [shape: f32[16,32], index: 1, kind: input, shape index: {}]   ;;  %s438_s3 = inlined_call_operand.vmem [shape: f32[1,32], index: 3, kind: input, shape index: {}]   ;;  %s439_s4 = inlined_call_operand.vmem [shape: f32[32,32], index: 4, kind: input, shape index: {}]   ;;  %s440_s0 = inlined_call_operand.vmem [shape: bf16[16,16], index: 0, kind: input, shape index: {}]   ;;  %s441_s5 = inlined_call_operand.vmem [shape: f32[1,32], index: 5, kind: input, shape index: {}]   ;;  %s442_s6 = inlined_call_operand.vmem [shape: f32[32,32], index: 6, kind: input, shape index: {}]   ;;  %s443_s7 = inlined_call_operand.vmem [shape: f32[1,32], index: 7, kind: input, shape index: {}]   ;;  %s444_s8 = inlined_call_operand.vmem [shape: f32[32,64], index: 8, kind: input, shape index: {}]   ;;  %s445_s9 = inlined_call_operand.vmem [shape: f32[1,64], index: 9, kind: input, shape index: {}]   ;;  %s446_s10 = inlined_call_operand.vmem [shape: f32[16,64], index: 10, kind: output, shape index: {}]  }
   0x1   :  { %v43_v0 = vld [vmem:[%s436_s2 + $0x18] sm:$0xff]  ;;  %v42_v1 = vld [vmem:[%s436_s2 + $0x10] sm:$0xff]  ;;  %v41_v2 = vld [vmem:[%s436_s2 + $0x8] sm:$0xff] }
   0x2   :  { %64 = vmatpush.msra.mxu0 %v43_v0  ;;  %v40_v3 = vld [vmem:[%s436_s2] sm:$0xff]  ;;  %v39_v5 = vld [vmem:[%s437_s1 + $0x8] sm:$0xff]  ;;  %v105_v6 = vld [vmem:[%s439_s4 + $0x18] sm:$0xff] }
   0x3   :  { %v38_v4 = vld [vmem:[%s437_s1] sm:$0xff]  ;;  %v104_v7 = vld [vmem:[%s439_s4 + $0x10] sm:$0xff]  ;;  %125 = vmatpush.msra.mxu2 %v105_v6  ;;  %v103_v12 = vld [vmem:[%s439_s4 + $0x8] sm:$0xff] }
   0x4   :  { %65 = vmatpush.msra.mxu0 %v42_v1  ;;  %v372_v11 = vld [vmem:[%s440_s0] sm:$0xff]  ;;  %v157_v19 = vld [vmem:[%s442_s6 + $0x18] sm:$0xff]  ;;  %v156_v20 = vld [vmem:[%s442_s6 + $0x10] sm:$0xff] }
   0x5   :  { %126 = vmatpush.msra.mxu2 %v104_v7  ;;  %v102_v13 = vld [vmem:[%s439_s4] sm:$0xff]  ;;  %v155_v24 = vld [vmem:[%s442_s6 + $0x8] sm:$0xff]  ;;  %v211_v31 = vld [vmem:[%s444_s8 + $0x18] sm:$0xff] }
   0x6   :  { %66 = vmatpush.msra.mxu0 %v41_v2  ;;  %v284_v14 = vld [vmem:[%s438_s3] ss:$0 sm:$0xff]  ;;  %v210_v35 = vld [vmem:[%s444_s8 + $0x10] sm:$0xff]  ;;  %v209_v36 = vld [vmem:[%s444_s8 + $0x8] sm:$0xff] }
   0x7   :  { %127 = vmatpush.msra.mxu2 %v103_v12  ;;  %v154_v25 = vld [vmem:[%s442_s6] sm:$0xff] }
   0x8   :  { %67 = vmatpush.msra.mxu0 %v40_v3  ;;  %v285_v26 = vld [vmem:[%s441_s5] ss:$0 sm:$0xff] }
   0x9   :  { %267 = vmatmul.msk.f32.vlgmr.msra.gmra.mxu0 %vm45_vm0, %v38_v4  ;;  %128 = vmatpush.msra.mxu2 %v102_v13  ;;  %v208_v37 = vld [vmem:[%s444_s8] sm:$0xff] }
   0xa   :  { %231 = vmatpush.msrb.mxu0 %v211_v31  ;;  %v286_v38 = vld [vmem:[%s443_s7] ss:$0 sm:$0xff] }
   0xb   :  { %v287_v48 = vld [vmem:[%s445_s9] ss:$0 sm:$0xff] }
   0xc   :  { %232 = vmatpush.msrb.mxu0 %v210_v35 }
   0xe   :  { %233 = vmatpush.msrb.mxu0 %v209_v36 }
  0x10   :  { %234 = vmatpush.msrb.mxu0 %v208_v37 }
  0x11   :  { %268 = vmatmul.msk.f32.gmra.mxu0 %vm45_vm0, %v39_v5 }
  0x86   :  { %v69_v8 = vpop.f32.mrf.mxu0 }
  0x8e   :  { %v72_v9 = vpop.f32.mrf.mxu0 }
  0x8f   :  { %v75_v10 = vpack.c.bf16 %v72_v9, %v69_v8 }
  0x91   :  { %95 = vmatpush.bf16.msra.mxu1 %v75_v10 }
  0x94   :  { %273 = vmatmul.msk.bf16.vlgmr.msra.gmra.mxu1 %vm84_vm1, %v372_v11 }
  0x95   :  { %177 = vmatpush.msrb.mxu1 %v157_v19 }
  0x97   :  { %178 = vmatpush.msrb.mxu1 %v156_v20 }
  0x99   :  { %179 = vmatpush.msrb.mxu1 %v155_v24 }
  0x9b   :  { %180 = vmatpush.msrb.mxu1 %v154_v25 }
 0x111   :  { %v97_v15 = vpop.f32.mrf.mxu1 }
 0x112   :  { %v98_v16 = vadd.f32 %v284_v14, %v97_v15 }
 0x114   :  { %274 = vmatmul.msk.f32.vlgmr.msra.gmra.mxu2 %vm45_vm0, %v98_v16 }
 0x119   :  { %v99_v17 = vpop.f32.mrf.mxu1 }
 0x11a   :  { %v100_v18 = vadd.f32 %v284_v14, %v99_v17 }
 0x11c   :  { %275 = vmatmul.msk.f32.gmra.mxu2 %vm45_vm0, %v100_v18 }
 0x197   :  { %v130_v21 = vpop.f32.mrf.mxu2 }
 0x19f   :  { %v133_v22 = vpop.f32.mrf.mxu2 }
 0x1a0   :  { %v136_v23 = vpack.c.bf16 %v133_v22, %v130_v21 }
 0x1a2   :  { %147 = vmatpush.bf16.msra.mxu3 %v136_v23 }
 0x1a5   :  { %276 = vmatmul.msk.bf16.vlgmr.msra.gmra.mxu3 %vm84_vm1, %v372_v11 }
 0x228   :  { %v149_v27 = vpop.f32.mrf.mxu3 }
 0x229   :  { %v150_v28 = vadd.f32 %v285_v26, %v149_v27 }
 0x22b   :  { %277 = vmatmul.msk.f32.vlgmr.msrb.gmra.mxu1 %vm45_vm0, %v150_v28 }
 0x230   :  { %v151_v29 = vpop.f32.mrf.mxu3 }
 0x231   :  { %v152_v30 = vadd.f32 %v285_v26, %v151_v29 }
 0x233   :  { %278 = vmatmul.msk.f32.gmra.mxu1 %vm45_vm0, %v152_v30 }
 0x2a8   :  { %v182_v32 = vpop.f32.mrf.mxu1 }
 0x2b0   :  { %v185_v33 = vpop.f32.mrf.mxu1 }
 0x2b1   :  { %v188_v34 = vpack.c.bf16 %v185_v33, %v182_v32 }
 0x2b3   :  { %199 = vmatpush.bf16.msrb.mxu3 %v188_v34 }
 0x2b6   :  { %279 = vmatmul.msk.bf16.vlgmr.msrb.gmra.mxu3 %vm84_vm1, %v372_v11 }
 0x339   :  { %v201_v39 = vpop.f32.mrf.mxu3 }
 0x33a   :  { %v202_v40 = vadd.f32 %v286_v38, %v201_v39 }
 0x33c   :  { %v206_v41 = vmax.f32 %v202_v40, 0.0 }
 0x33e   :  { %280 = vmatmul.msk.f32.vlgmr.msrb.gmra.mxu0 %vm45_vm0, %v206_v41 }
 0x341   :  { %v203_v42 = vpop.f32.mrf.mxu3 }
 0x342   :  { %v204_v43 = vadd.f32 %v286_v38, %v203_v42 }
 0x344   :  { %v207_v44 = vmax.f32 %v204_v43, 0.0 }
 0x346   :  { %281 = vmatmul.msk.f32.gmra.mxu0 %vm45_vm0, %v207_v44 }
 0x3bb   :  { %v236_v45 = vpop.f32.mrf.mxu0 }
 0x3c3   :  { %v239_v46 = vpop.f32.mrf.mxu0 }
 0x3c4   :  { %v242_v47 = vpack.c.bf16 %v239_v46, %v236_v45 }
 0x3c6   :  { %253 = vmatpush.bf16.msrb.mxu2 %v242_v47 }
 0x3c9   :  { %282 = vmatmul.msk.bf16.vlgmr.msrb.gmra.mxu2 %vm84_vm1, %v372_v11 }
 0x44c   :  { %v255_v49 = vpop.f32.mrf.mxu2 }
 0x44d   :  { %v256_v50 = vadd.f32 %v287_v48, %v255_v49 }
 0x44f   :  { %261 = vst.msk [vmem:[%s446_s10] sm:$0xff] %vm260_vm2, %v256_v50 }
 0x454   :  { %v257_v51 = vpop.f32.mrf.mxu2 }
 0x455   :  { %v258_v52 = vadd.f32 %v287_v48, %v257_v51 }
 0x457   :  { %262 = vst.msk [vmem:[%s446_s10 + $0x8] sm:$0xff] %vm260_vm2, %v258_v52 }

</bundles_post_ra>
